<compile_context>
chip_gen: v7x
topology: tpu7x:2x2x1
jax: 0.10.0
libtpu: 0.0.40
codegen_flags: <defaults>
</compile_context>

<pallas_src>
import inspect

import jax
import jax.numpy as jnp
from jax.experimental import pallas as pl
from jax.experimental.pallas import tpu as pltpu


def _round_up(x, m):
    return (x + m - 1) // m * m


def _sublane_pack(dtype):
    # Rows per packed (8-sublane x 32-bit) group: f32 -> 8, bf16 -> 16, int8/fp8 -> 32.
    return 8 * max(1, 4 // jnp.dtype(dtype).itemsize)


def _vmem_capacity_bytes():
    # Generation-aware VMEM size (v5e/v6e: 128 MiB; v7x: 64 MiB per TensorCore).
    try:
        return int(pltpu.get_tpu_info().vmem_capacity_bytes)
    except Exception:
        return 64 * 2 ** 20  # conservative (v7x) fallback


def _supports_buffered():
    # Explicit capability check (replaces the old broad try/except fallback).
    if not hasattr(pl, "Buffered"):
        return False
    try:
        return "pipeline_mode" in inspect.signature(pl.BlockSpec).parameters
    except (ValueError, TypeError):
        return True


_SINGLE_BUFFER_WEIGHTS = _supports_buffered()


def adapter_kernel(x_ref, wd_ref, bd_ref, wu_ref, bu_ref, o_ref):
    # x_ref: (tm, dim)   wd_ref: (dim, A)   bd_ref: (1, A)
    # wu_ref: (A, dim)   bu_ref: (1, dim)   o_ref: (tm, dim)
    x = x_ref[...]
    h = jnp.dot(x, wd_ref[...], preferred_element_type=jnp.float32)
    h = jnp.maximum(h + bd_ref[...].astype(jnp.float32), 0.0)          # ReLU
    y = jnp.dot(h.astype(wu_ref.dtype), wu_ref[...],
                preferred_element_type=jnp.float32)
    y = y + bu_ref[...].astype(jnp.float32) + x.astype(jnp.float32)    # residual
    o_ref[...] = y.astype(o_ref.dtype)


def adapter_forward(x, w_down, b_down, w_up, b_up, *, tm=512):
    """x: [B, S, dim] -> [B, S, dim].  Weights stored as [in, out]."""
    B, S, dim = x.shape
    A = w_down.shape[1]
    M = B * S
    xbytes = jnp.dtype(x.dtype).itemsize

    # Cast wider weights down to the activation dtype (VMEM win on v7x; the
    # weights are read from HBM only once regardless, so no bandwidth cost).
    if jnp.dtype(w_down.dtype).itemsize > xbytes:
        w_down = w_down.astype(x.dtype)
        b_down = b_down.astype(x.dtype)
        w_up = w_up.astype(x.dtype)
        b_up = b_up.astype(x.dtype)
    wbytes = jnp.dtype(w_down.dtype).itemsize

    # --- lane-pad the adapter width to a multiple of 128 (zeros are exact) ---
    A_pad = _round_up(A, 128)
    if A_pad != A:
        w_down = jnp.pad(w_down, ((0, 0), (0, A_pad - A)))
        b_down = jnp.pad(b_down, (0, A_pad - A))
        w_up = jnp.pad(w_up, ((0, A_pad - A), (0, 0)))
    # NOTE: dim (output lanes) is intentionally NOT padded: typical model dims
    # are 128-aligned already, and padding x along dim would cost an extra full
    # HBM read+write pass over x and y.  Non-aligned dims still run correctly
    # (masked partial stores).

    # --- row-tile selection: sublane-packed, large, >= 2 grid steps if M allows ---
    pack = _sublane_pack(x.dtype)
    tm_eff = max(pack, min(_round_up(tm, pack), _round_up(M, pack)))
    if pl.cdiv(M, tm_eff) < 2 and M > pack:
        # Feed both TensorCores on v7x (and keep the DMA pipeline warm).
        tm_eff = max(pack, _round_up(pl.cdiv(M, 2), pack))

    # --- generation-aware VMEM budget, including f32 intermediates ---
    wbuf = 1 if _SINGLE_BUFFER_WEIGHTS else 2
    weight_bytes = (2 * dim * A_pad + A_pad + dim) * wbytes

    def vmem_need(tm_):
        io = 2 * 2 * tm_ * dim * xbytes                # x + y tiles, double-buffered
        interm = tm_ * A_pad * 4 + 2 * tm_ * dim * 4   # f32 h, f32 acc, f32 x upcast
        return io + wbuf * weight_bytes + interm

    budget = int(0.85 * _vmem_capacity_bytes())
    while vmem_need(tm_eff) > budget and tm_eff > pack:
        tm_eff = max(pack, _round_up(tm_eff // 2, pack))
    vmem_limit = int(min(budget, max(32 * 2 ** 20, int(vmem_need(tm_eff) * 1.25))))

    grid = (pl.cdiv(M, tm_eff),)

    def w_spec(shape):
        # Resident block (constant index_map -> DMA'd from HBM once).
        if _SINGLE_BUFFER_WEIGHTS:
            return pl.BlockSpec(shape, lambda i: (0,) * len(shape),
                                pipeline_mode=pl.Buffered(1))
        return pl.BlockSpec(shape, lambda i: (0,) * len(shape))

    cost = pl.CostEstimate(
        flops=4 * M * dim * A_pad,
        transcendentals=0,
        bytes_accessed=2 * M * dim * xbytes + weight_bytes)

    x2 = x.reshape(M, dim)
    bd2 = b_down.reshape(1, A_pad)
    bu2 = b_up.reshape(1, dim)

    out = pl.pallas_call(
        adapter_kernel,
        out_shape=jax.ShapeDtypeStruct((M, dim), x.dtype),
        grid_spec=pltpu.PrefetchScalarGridSpec(
            num_scalar_prefetch=0,
            grid=grid,
            in_specs=[
                pl.BlockSpec((tm_eff, dim), lambda i: (i, 0)),   # x row tile
                w_spec((dim, A_pad)),                            # W_down (resident)
                w_spec((1, A_pad)),                              # b_down
                w_spec((A_pad, dim)),                            # W_up   (resident)
                w_spec((1, dim)),                                # b_up
            ],
            out_specs=pl.BlockSpec((tm_eff, dim), lambda i: (i, 0)),
        ),
        compiler_params=pltpu.CompilerParams(
            dimension_semantics=("parallel",),
            vmem_limit_bytes=vmem_limit),
        cost_estimate=cost,
    )(x2, w_down, bd2, w_up, bu2)

    return out.reshape(B, S, dim)


if __name__ == "__main__":
    # ---------- small fp32 check (shapes consistent with the module) ----------
    B, S, dim, adapter_dim = 2, 8, 32, 16
    key = jax.random.PRNGKey(0)
    kx, kwd, kbd, kwu, kbu = jax.random.split(key, 5)

    x = jax.random.normal(kx, (B, S, dim), dtype=jnp.float32)
    bound_d = 1.0 / (dim ** 0.5)
    w_down = jax.random.uniform(kwd, (dim, adapter_dim), jnp.float32,
                                -bound_d, bound_d)
    b_down = jax.random.uniform(kbd, (adapter_dim,), jnp.float32,
                                -bound_d, bound_d)
    bound_u = 1.0 / (adapter_dim ** 0.5)
    w_up = jax.random.uniform(kwu, (adapter_dim, dim), jnp.float32,
                              -bound_u, bound_u)
    b_up = jax.random.uniform(kbu, (dim,), jnp.float32, -bound_u, bound_u)

    y = adapter_forward(x, w_down, b_down, w_up, b_up)
    jax.block_until_ready(y)

    h_ref = jnp.maximum(x @ w_down + b_down, 0.0)
    y_ref = x + h_ref @ w_up + b_up
    assert jnp.allclose(y, y_ref, atol=1e-5, rtol=1e-5), "fp32 mismatch vs ref"

    # ---- bf16 path exercising a partial last row-block (M % tm != 0) and ----
    # ---- adapter-dim lane padding (A=64 -> 128).                         ----
    B2, S2, dim2, A2 = 3, 40, 256, 64          # M = 120, tm = 64 -> grid 2, last block partial
    kx2, kwd2, kbd2, kwu2, kbu2 = jax.random.split(jax.random.PRNGKey(1), 5)
    xb = jax.random.normal(kx2, (B2, S2, dim2), dtype=jnp.float32)
    wdb = jax.random.uniform(kwd2, (dim2, A2), jnp.float32, -1 / 16, 1 / 16)
    bdb = jax.random.uniform(kbd2, (A2,), jnp.float32, -1 / 16, 1 / 16)
    wub = jax.random.uniform(kwu2, (A2, dim2), jnp.float32, -1 / 8, 1 / 8)
    bub = jax.random.uniform(kbu2, (dim2,), jnp.float32, -1 / 8, 1 / 8)

    yb = adapter_forward(xb.astype(jnp.bfloat16), wdb.astype(jnp.bfloat16),
                         bdb.astype(jnp.bfloat16), wub.astype(jnp.bfloat16),
                         bub.astype(jnp.bfloat16), tm=64)
    jax.block_until_ready(yb)

    xb32 = xb.astype(jnp.bfloat16).astype(jnp.float32)
    wdb32 = wdb.astype(jnp.bfloat16).astype(jnp.float32)
    bdb32 = bdb.astype(jnp.bfloat16).astype(jnp.float32)
    wub32 = wub.astype(jnp.bfloat16).astype(jnp.float32)
    bub32 = bub.astype(jnp.bfloat16).astype(jnp.float32)
    hb_ref = jnp.maximum(xb32 @ wdb32 + bdb32, 0.0)
    yb_ref = xb32 + hb_ref @ wub32 + bub32
    assert jnp.allclose(yb.astype(jnp.float32), yb_ref, atol=1e-1, rtol=1e-1), \
        "bf16 mismatch vs ref"

    print("KERNEL_OK")
</pallas_src>

<mosaic_0001>
module attributes {stable_mosaic.version = 11 : i64} {
  func.func @adapter_kernel(%arg0: i32, %arg1: memref<8x32xf32, #tpu.memory_space<vmem>>, %arg2: memref<32x128xf32, #tpu.memory_space<vmem>>, %arg3: memref<1x128xf32, #tpu.memory_space<vmem>>, %arg4: memref<128x32xf32, #tpu.memory_space<vmem>>, %arg5: memref<1x32xf32, #tpu.memory_space<vmem>>, %arg6: memref<8x32xf32, #tpu.memory_space<vmem>>) attributes {dimension_semantics = [#tpu.dimension_semantics<parallel>], iteration_bounds = array<i64: 2>, scalar_prefetch = 0 : i64, scratch_operands = 0 : i64, tpu.core_type = #tpu.core_type<tc>, window_params = [{transform_indices = @transform_0, window_bounds = array<i64: 8, 32>}, {pipeline_mode = #tpu.pipeline_mode<synchronous>, transform_indices = @transform_1, window_bounds = array<i64: 32, 128>}, {pipeline_mode = #tpu.pipeline_mode<synchronous>, transform_indices = @transform_2, window_bounds = array<i64: 1, 128>}, {pipeline_mode = #tpu.pipeline_mode<synchronous>, transform_indices = @transform_3, window_bounds = array<i64: 128, 32>}, {pipeline_mode = #tpu.pipeline_mode<synchronous>, transform_indices = @transform_4, window_bounds = array<i64: 1, 32>}, {transform_indices = @transform_5, window_bounds = array<i64: 8, 32>}]} {
    %c0 = arith.constant 0 : index
    %c0_0 = arith.constant 0 : index
    %0 = vector.load %arg1[%c0, %c0_0] : memref<8x32xf32, #tpu.memory_space<vmem>>, vector<8x32xf32>
    %c0_1 = arith.constant 0 : index
    %c0_2 = arith.constant 0 : index
    %1 = vector.load %arg2[%c0_1, %c0_2] : memref<32x128xf32, #tpu.memory_space<vmem>>, vector<32x128xf32>
    %cst = arith.constant dense<0.000000e+00> : vector<8x128xf32>
    %2 = tpu.matmul %0, %1, %cst {dimension_numbers = #tpu.dot_dimension_numbers<[1], [0], [0], [1], [0, 0, 1, 1], [], []>} : vector<8x32xf32>, vector<32x128xf32>, vector<8x128xf32> -> vector<8x128xf32>
    %c0_3 = arith.constant 0 : index
    %c0_4 = arith.constant 0 : index
    %3 = vector.load %arg3[%c0_3, %c0_4] : memref<1x128xf32, #tpu.memory_space<vmem>>, vector<1x128xf32>
    %4 = vector.broadcast %3 : vector<1x128xf32> to vector<8x128xf32>
    %5 = arith.addf %2, %4 : vector<8x128xf32>
    %cst_5 = arith.constant 0.000000e+00 : f32
    %6 = vector.broadcast %cst_5 : f32 to vector<8x128xf32>
    %7 = arith.maximumf %5, %6 : vector<8x128xf32>
    %c0_6 = arith.constant 0 : index
    %c0_7 = arith.constant 0 : index
    %8 = vector.load %arg4[%c0_6, %c0_7] : memref<128x32xf32, #tpu.memory_space<vmem>>, vector<128x32xf32>
    %cst_8 = arith.constant dense<0.000000e+00> : vector<8x32xf32>
    %9 = tpu.matmul %7, %8, %cst_8 {dimension_numbers = #tpu.dot_dimension_numbers<[1], [0], [0], [1], [0, 0, 1, 1], [], []>} : vector<8x128xf32>, vector<128x32xf32>, vector<8x32xf32> -> vector<8x32xf32>
    %c0_9 = arith.constant 0 : index
    %c0_10 = arith.constant 0 : index
    %10 = vector.load %arg5[%c0_9, %c0_10] : memref<1x32xf32, #tpu.memory_space<vmem>>, vector<1x32xf32>
    %11 = vector.broadcast %10 : vector<1x32xf32> to vector<8x32xf32>
    %12 = arith.addf %9, %11 : vector<8x32xf32>
    %13 = arith.addf %12, %0 : vector<8x32xf32>
    %c0_11 = arith.constant 0 : index
    %c0_12 = arith.constant 0 : index
    %14 = vector.load %arg6[%c0_11, %c0_12] : memref<8x32xf32, #tpu.memory_space<vmem>>, vector<8x32xf32>
    tpu.vector_store %arg6[%c0_11, %c0_12], %13 {strides = array<i32>} : memref<8x32xf32, #tpu.memory_space<vmem>>, vector<8x32xf32>,
    return
  }
  func.func @transform_0(%arg0: i32) -> (i32, i32) {
    %c0_i32 = arith.constant 0 : i32
    %c0_i32_0 = arith.constant 0 : i32
    return %arg0, %c0_i32 : i32, i32
  }
  func.func @transform_1(%arg0: i32) -> (i32, i32) {
    %c0_i32 = arith.constant 0 : i32
    %c0_i32_0 = arith.constant 0 : i32
    %c0_i32_1 = arith.constant 0 : i32
    return %c0_i32, %c0_i32_0 : i32, i32
  }
  func.func @transform_2(%arg0: i32) -> (i32, i32) {
    %c0_i32 = arith.constant 0 : i32
    %c0_i32_0 = arith.constant 0 : i32
    %c0_i32_1 = arith.constant 0 : i32
    return %c0_i32, %c0_i32_0 : i32, i32
  }
  func.func @transform_3(%arg0: i32) -> (i32, i32) {
    %c0_i32 = arith.constant 0 : i32
    %c0_i32_0 = arith.constant 0 : i32
    %c0_i32_1 = arith.constant 0 : i32
    return %c0_i32, %c0_i32_0 : i32, i32
  }
  func.func @transform_4(%arg0: i32) -> (i32, i32) {
    %c0_i32 = arith.constant 0 : i32
    %c0_i32_0 = arith.constant 0 : i32
    %c0_i32_1 = arith.constant 0 : i32
    return %c0_i32, %c0_i32_0 : i32, i32
  }
  func.func @transform_5(%arg0: i32) -> (i32, i32) {
    %c0_i32 = arith.constant 0 : i32
    %c0_i32_0 = arith.constant 0 : i32
    return %arg0, %c0_i32 : i32, i32
  }
}

</mosaic_0001>

<bundles_post_ra>
// kernel: tpu_custom_call.1
= control target key start
LH: loop header
LB: loop body
LE: loop exit
PB: predicated region body
PF: predicated region fallthrough
CT: control target
= control target key end

     0   :  { %10 = vsyncpa [#allocation3], 0  ;;  %s894_s0 = inlined_call_operand.vmem [shape: f32[16,32], index: 0, kind: input, shape index: {}]   ;;  %s895_s1 = inlined_call_operand.vmem [shape: f32[32,128], index: 1, kind: input, shape index: {}]   ;;  %s896_s2 = inlined_call_operand.vmem [shape: f32[1,128], index: 2, kind: input, shape index: {}]   ;;  %s897_s3 = inlined_call_operand.vmem [shape: f32[128,32], index: 3, kind: input, shape index: {}]   ;;  %s898_s4 = inlined_call_operand.vmem [shape: f32[1,32], index: 4, kind: input, shape index: {}]   ;;  %s899_s5 = inlined_call_operand.hbm [shape: f32[16,32], index: 5, kind: output, shape index: {}]  }
   0x1   :  { %12 = vsyncpa [#allocation3 + $0x1], 0  ;;  %s726_s18 = smov 0   ;;  %s728_s19 = smov 0  }
   0x2   :  { %s730_s20 = smov 0   ;;  %s732_s21 = smov 0  }
   0x3 LB: > { %s747_s22 = sadd.s32 4294967295, %s690_s21   ;;  %s475_s23 = sadd.s32 4294967294, %s690_s21   ;;  %s690_s21 = sphi %s732_s21, %s905_s21   ;;  %s686_s20 = sphi %s730_s20, %s904_s20   ;;  %s682_s19 = sphi %s728_s19, %s903_s19   ;;  %s678_s18 = sphi %s726_s18, %s902_s18  }
   0x4   : > { %s751_s24 = sadd.s32 1, %s690_s21   ;;  %s135_s25 = sadd.s32 1, %s686_s20 }
   0x5   : > { %s132_s26 = ssub.s32 %s690_s21, %s751_s24  ;;  %p145_p0 = scmp.ne.s32.totalorder %s686_s20, %s682_s19 }
   0x6   : > { %p133_p1 = scmp.eq.s32.totalorder %s132_s26, 0  ;;  %p146_p2 = scmp.eq.s32.totalorder %s747_s22, 1 }
   0x7   : > { %p151_p3 = scmp.ne.s32.totalorder %s682_s19, %s678_s18  ;;  %p152_p4 = scmp.eq.s32.totalorder %s475_s23, 1 }
   0x8   : > { %s762_s27 = scalar_select %p133_p1, %s686_s20, %s135_s25  }
   0x9   : > { %p764_p5 = por %p146_p2, %p145_p0  ;;  %p768_p6 = por %p152_p4, %p151_p3 }
   0xa   : > { %p478_p7 = scmp.ge.s32.totalorder %s690_s21, 1  ;;  %p189_p8 = scmp.lt.s32.totalorder %s690_s21, 3 }
   0xc   : > { %p190_p9 = pnand %p478_p7, %p189_p8 }
   0xd   : > { %v221_v0 = vld [vmem:[%s895_s1] sm:$0xff] (!%p190_p9)  ;;  %v222_v1 = vld [vmem:[%s895_s1 + $0x8] sm:$0xff] (!%p190_p9)  ;;  %v223_v2 = vld [vmem:[%s895_s1 + $0x10] sm:$0xff] (!%p190_p9)  ;;  %v692_v3 = vmov (!%p190_p9), 0.0|0.0   ;;  %vm693_vm0 = vmmov (!%p190_p9), 0   ;;  %v694_v6 = vmov (!%p190_p9), 0.0  }
   0xe   : > { %193 = sbr.rel (%p190_p9) target bundleno = 472 (0x1d8), region = 40  ;;  %556 = vmatprep.subr.bf16.mxu0 (!%p190_p9), %v692_v3  ;;  %v557_v4 = vpack.c.bf16 (!%p190_p9), %v222_v1, %v221_v0  ;;  %v224_v5 = vld [vmem:[%s895_s1 + $0x18] sm:$0xff] (!%p190_p9)  ;;  %518 = vmatprep.mubr.msk.f32.mxu0 (!%p190_p9), %vm693_vm0, %v694_v6  ;;  %p216_p10 = scmp.lt.s32.totalorder (!%p190_p9), %s747_s22, 1  ;;  %v307_v7 = vld [vmem:[%s897_s3] sm:$0xff] (!%p190_p9)  ;;  %v308_v8 = vld [vmem:[%s897_s3 + $0x8] sm:$0xff] (!%p190_p9)  ;;  %vm232_vm1 = vcmask (!%p190_p9), 261120  }
   0xf   : > { %562 = vmatprep.subr.bf16.mxu1 (!%p190_p9), %v692_v3  ;;  %v563_v9 = vpack.c.bf16 (!%p190_p9), %v308_v8, %v307_v7  ;;  %v309_v10 = vld [vmem:[%s897_s3 + $0x10] sm:$0xff] (!%p190_p9)  ;;  %v310_v11 = vld [vmem:[%s897_s3 + $0x18] sm:$0xff] (!%p190_p9)  ;;  %553 = vmatprep.mubr.msk.f32.mxu1 (!%p190_p9), %vm693_vm0, %v694_v6  ;;  %v560_v12 = vpack.c.bf16 (!%p190_p9), %v224_v5, %v223_v2  ;;  %v311_v14 = vld [vmem:[%s897_s3 + $0x20] sm:$0xff] (!%p190_p9)  ;;  %s213_s26 = sand.u32 (!%p190_p9), 1, %s682_s19   ;;  %s485_s8 = sshll.u32 (!%p190_p9), %s747_s22, 7 }
  0x10   : > { %558 = vmatpush3.bf16.msra.mxu0 (!%p190_p9), %v557_v4  ;;  %v566_v13 = vpack.c.bf16 (!%p190_p9), %v310_v11, %v309_v10  ;;  %v312_v15 = vld [vmem:[%s897_s3 + $0x28] sm:$0xff] (!%p190_p9)  ;;  %v313_v18 = vld [vmem:[%s897_s3 + $0x30] sm:$0xff] (!%p190_p9)  ;;  %v314_v19 = vld [vmem:[%s897_s3 + $0x38] sm:$0xff] (!%p190_p9)  ;;  %s403_s14 = scalar_lea.sflag (!%p190_p9), [#allocation3], %s213_s26 }
  0x11   : > { %559 = vmatprep.subr.bf16.mxu0 (!%p190_p9), %v692_v3  ;;  %564 = vmatpush3.bf16.msra.mxu1 (!%p190_p9), %v563_v9  ;;  %v569_v17 = vpack.c.bf16 (!%p190_p9), %v312_v15, %v311_v14  ;;  %v572_v20 = vpack.c.bf16 (!%p190_p9), %v314_v19, %v313_v18  ;;  %v315_v21 = vld [vmem:[%s897_s3 + $0x40] sm:$0xff] (!%p190_p9)  ;;  %v316_v22 = vld [vmem:[%s897_s3 + $0x48] sm:$0xff] (!%p190_p9)  ;;  %v317_v24 = vld [vmem:[%s897_s3 + $0x50] sm:$0xff] (!%p190_p9) }
  0x12   : > { %565 = vmatprep.subr.bf16.mxu1 (!%p190_p9), %v692_v3  ;;  %v575_v23 = vpack.c.bf16 (!%p190_p9), %v316_v22, %v315_v21  ;;  %v318_v25 = vld [vmem:[%s897_s3 + $0x58] sm:$0xff] (!%p190_p9)  ;;  %v319_v27 = vld [vmem:[%s897_s3 + $0x60] sm:$0xff] (!%p190_p9)  ;;  %v320_v28 = vld [vmem:[%s897_s3 + $0x68] sm:$0xff] (!%p190_p9) }
  0x13   : > { %v578_v26 = vpack.c.bf16 (!%p190_p9), %v318_v25, %v317_v24  ;;  %v581_v29 = vpack.c.bf16 (!%p190_p9), %v320_v28, %v319_v27  ;;  %v321_v30 = vld [vmem:[%s897_s3 + $0x70] sm:$0xff] (!%p190_p9)  ;;  %v322_v31 = vld [vmem:[%s897_s3 + $0x78] sm:$0xff] (!%p190_p9)  ;;  %v481_v33 = vld [vmem:[%s896_s2] ss:$0 sm:$0xff] (!%p190_p9) }
  0x14   : > { %561 = vmatpush3.bf16.msra.mxu0 (!%p190_p9), %v560_v12  ;;  %v584_v32 = vpack.c.bf16 (!%p190_p9), %v322_v31, %v321_v30  ;;  %v483_v38 = vld [vmem:[%s898_s4] ss:$0 sm:$0xff] (!%p190_p9) }
  0x15   : > { %s217_s30 = scalar_select %p216_p10, %s747_s22, 1  ;;  %567 = vmatpush3.bf16.msra.mxu1 %v566_v13 }
  0x16   : > { %568 = vmatprep.subr.bf16.mxu1 %v692_v3  ;;  %s695_s22 = smov [#allocation2]  }
  0x17   : > { %s480_s6 = sshll.u32 %s217_s30, 3  ;;  %s479_s30 = sshll.u32 %s213_s26, 3 }
  0x18   : > { %s219_s13 = scalar_lea.vmem %s894_s0, %s480_s6  ;;  %s215_s9 = scalar_lea.vmem [#allocation2], %s479_s30 }
  0x19   : > { %v220_v16 = vld [vmem:[%s219_s13] sm:$0xff]  ;;  %570 = vmatpush3.bf16.msra.mxu1 %v569_v17  ;;  %s416_s10 = sshll.u32 %s215_s9, 4  ;;  %s851_s13 = scalar_lea.hbm %s899_s5, %s485_s8  ;;  %s853_s10 = int_to_ptr.vmem [resolvable:$true] %s416_s10 }
  0x1a   : > { %519 = vmatmul.mubr.msk.f32.vlgmr.msra.gmra.mrb[0].mxu0 %vm232_vm1, %v220_v16  ;;  %571 = vmatprep.subr.bf16.mxu1 %v692_v3  ;;  %s628_s15 = scalar_lea.vmem %s853_s10, 128  ;;  %s632_s16 = sshll.u32 %s695_s22, 4  ;;  %s633_s16 = int_to_ptr.vmem [resolvable:$false] %s632_s16 }
  0x1b   : > { %p629_p11 = scmp.ne.s32.totalorder %s853_s10, %s628_s15  ;;  %s634_s17 = scalar_lea.vmem %s633_s16, 256 }
  0x1c   : > { %p635_p0 = scmp.lt.s32.totalorder %s853_s10, %s633_s16  ;;  %p636_p1 = scmp.lt.s32.totalorder %s634_s17, %s628_s15 }
  0x1d   : > { %573 = vmatpush3.bf16.msra.mxu1 %v572_v20  ;;  %p630_p12 = pnand %p629_p11, %p764_p5 }
  0x1e   : > { %574 = vmatprep.subr.bf16.mxu1 %v692_v3  ;;  %p637_p2 = por %p636_p1, %p635_p0 }
  0x1f   : > { %p631_p13 = pneg %p630_p12 }
  0x21   : > { %576 = vmatpush3.bf16.msra.mxu1 %v575_v23  ;;  %p638_p3 = pnand %p637_p2, %p631_p13 }
  0x22   : > { %577 = vmatprep.subr.bf16.mxu1 %v692_v3 }
  0x25   : > { %579 = vmatpush3.bf16.msra.mxu1 %v578_v26 }
  0x26   : > { %580 = vmatprep.subr.bf16.mxu1 %v692_v3 }
  0x29   : > { %582 = vmatpush3.bf16.msra.mxu1 %v581_v29 }
  0x2a   : > { %583 = vmatprep.subr.bf16.mxu1 %v692_v3 }
  0x2d   : > { %585 = vmatpush3.bf16.msra.mxu1 %v584_v32 }
  0xed   : > { %v302_v34 = vpop.f32.mrb[0].mxu0 }
  0xee   : > { %v303_v35 = vadd.f32 %v481_v33, %v302_v34  ;;  %v520_v36 = vpop.f32.mrb[1].mxu0 }
  0xf0   : > { %v306_v37 = vmax.f32 %v303_v35, 0.0 }
  0xf2   : > { %554 = vmatmul.mubr.f32.vlgmr.msra.gmra.mrb[0].mxu1 %v306_v37 }
 0x1c5   : > { %v396_v39 = vpop.f32.mrb[0].mxu1 }
 0x1c6   : > { %v397_v40 = vadd.f32 %v483_v38, %v396_v39  ;;  %v555_v41 = vpop.f32.mrb[1].mxu1 }
 0x1c8   : > { %v400_v42 = vadd.f32 %v397_v40, %v220_v16 }
 0x1ca   : > { %401 = vst.msk [vmem:[%s215_s9] sm:$0xff] %vm232_vm1, %v400_v42 }
 0x1cb   : > { %641 = shalt.err (!%p638_p3)
}
 0x1cc   : > { %s642_s23 = scalar_lea.hbm %s851_s13, 128  ;;  %s646_s30 = scalar_lea.hbm %s899_s5, 256 }
 0x1cd   : > { %p643_p4 = scmp.ne.s32.totalorder %s851_s13, %s642_s23  ;;  %p647_p9 = scmp.lt.u32.totalorder %s851_s13, %s899_s5 }
 0x1ce   : > { %p648_p10 = scmp.lt.u32.totalorder %s646_s30, %s642_s23  ;;  %p650_p12 = scmp.lt.u32.totalorder %s642_s23, %s851_s13 }
 0x1cf   : > { %p644_p7 = pnand %p643_p4, %p764_p5 }
 0x1d0   : > { %p649_p11 = por %p648_p10, %p647_p9 }
 0x1d1   : > { %p645_p8 = pneg %p644_p7 }
 0x1d2   : > { %p651_p13 = por %p650_p12, %p649_p11 }
 0x1d4   : > { %p652_p0 = pnand %p651_p13, %p645_p8 }
 0x1d6   : > { %655 = shalt.err (!%p652_p0)
}
 0x1d7   : > { %586 = dma.vmem_to_hbm [thread:$0]  (%p764_p5), %s853_s10, 128, %s851_s13, %s403_s14  }
 0x1d8 PF: > { %p592_p1 = scmp.ge.s32.totalorder %s690_s21, 2  ;;  %s428_s8 = sand.u32 1, %s678_s18  }
 0x1d9   : > { %s429_s9 = scalar_lea.sflag [#allocation3], %s428_s8 }
 0x1da   : > { %p589_p2 = pnand %p592_p1, %p768_p6 }
 0x1dc   : > { %673 = dma.done.wait (!%p589_p2), %s429_s9, 128  }
 0x1dd   : > { %675 = vsyncadd (!%p589_p2), %s429_s9, 4294967168  ;;  %p15_p3 = scmp.ge.s32.totalorder %s751_s24, 4   ;;  %s902_s18 = smov %s682_s19 }
 0x1de   : > { %s903_s19 = smov %s686_s20  ;;  %s904_s20 = smov %s762_s27 }
 0x1df   : > { %s905_s21 = smov %s751_s24  ;;  %17 = sbr.rel (!%p15_p3) target bundleno = 3 (0x3), region = 75 }
 0x1e6   :  { %434 = vsyncpa [#allocation3], 1 }
 0x1e7   :  { %436 = vsyncpa [#allocation3 + $0x1], 1 }

</bundles_post_ra>
